<compile_context>
chip_gen: v5e
topology: v5e:2x2
jax: 0.10.0
libtpu: 0.0.40
codegen_flags: <defaults>
</compile_context>

<pallas_src>
import functools

import jax
import jax.numpy as jnp
from jax.experimental import pallas as pl
from jax.experimental.pallas import tpu as pltpu

# ----------------------------------------------------------------------------
# Model geometry
# ----------------------------------------------------------------------------
LAYER_DIMS = [300, 150, 100, 50, 25, 10, 5, 2]
N_LAYERS = len(LAYER_DIMS) - 1          # 7 Linear layers; ReLU after all but last

# Padded feature widths carried through the kernel.  PAD_DIMS[i] is the lane
# width of the layer-i activation and the row count of layer i's block inside
# the packed weight slab.  Tail layers pad to one lane tile (128); the input
# pads to a 16-row multiple (304) and the first hidden to 256.  All padded
# weight rows / bias cols are zero => padded activation lanes stay exactly 0.
PAD_DIMS = [304, 256, 128, 128, 128, 128, 128, 128]
W_COLS = 256                            # packed-weight lane width (max padded out)

ROW_OFFSETS = [0]
for _i in range(N_LAYERS):
    ROW_OFFSETS.append(ROW_OFFSETS[-1] + PAD_DIMS[_i])
TOTAL_W_ROWS = ROW_OFFSETS[-1]          # 304+256+5*128 = 1200  (~600 KB bf16)

_MIN_TILE = 16                          # bf16 native (16, 128) sublane tiling
_FLOPS_PER_ROW = 2 * sum(
    LAYER_DIMS[i] * LAYER_DIMS[i + 1] for i in range(N_LAYERS)
)


# ----------------------------------------------------------------------------
# Kernel
# ----------------------------------------------------------------------------
def mlp_kernel(x_ref, w_ref, b_ref, out_ref):
    """Whole-MLP forward for one batch tile.

    x_ref:   (tm, 304) bf16    — batch tile, zero-padded lanes 300..303
    w_ref:   (1200, 256) bf16  — all 7 weight matrices, packed & zero-padded
    b_ref:   (7, 256) f32      — all 7 biases, zero-padded
    out_ref: (tm, 128) f32     — final layer output, lanes 2..127 are zero
    """
    h = x_ref[...]                                   # bf16 activations
    for li in range(N_LAYERS):
        k = PAD_DIMS[li]                             # padded K (rows of W block)
        n = PAD_DIMS[li + 1]                         # padded N (out width)
        r0 = ROW_OFFSETS[li]
        w = w_ref[r0:r0 + k, :n]                     # static, tile-aligned slice
        # bf16 x bf16 -> f32 on the MXU (single pass), bias add in f32.
        y = jnp.dot(h, w, preferred_element_type=jnp.float32) + b_ref[li:li + 1, :n]
        if li < N_LAYERS - 1:
            # Downcast to bf16 first, then ReLU: identical math (monotone cast,
            # exact 0), half the VPU vreg traffic on bf16-VALU chips.
            h = jnp.maximum(y.astype(jnp.bfloat16), 0.0)
        else:
            h = y                                    # final Linear(5, 2): no ReLU
    out_ref[...] = h.astype(out_ref.dtype)           # lane-dense (tm, 128) store


# ----------------------------------------------------------------------------
# Host-side helpers
# ----------------------------------------------------------------------------
def _round_up(x, m):
    return ((x + m - 1) // m) * m


def _num_tensorcores():
    """TensorCores per JAX device (megacore awareness). Conservative default 1."""
    try:
        kind = jax.devices()[0].device_kind.lower()
    except Exception:
        return 1
    if "lite" in kind or "v5e" in kind or "v6e" in kind or "v6 lite" in kind:
        return 1                                      # single-TC chips
    if "v7" in kind or "v5p" in kind or "v4" in kind:
        return 2                                      # megacore chips
    return 1


def _choose_tile(batch, tile_m, num_cores):
    """Core-count-aware batch tiling.

    Single-TC chips: one tile covering the whole (padded) batch when it fits.
    Multi-TC chips: exactly `num_cores` balanced grid steps for small/medium
    batches; `tile_m`-row tiles for large batches.
    """
    b_pad = _round_up(batch, _MIN_TILE)
    max_tile = max(_MIN_TILE, _round_up(tile_m, _MIN_TILE))
    if b_pad <= max_tile * num_cores:
        tm = _round_up(-(-b_pad // num_cores), _MIN_TILE)
    else:
        tm = max_tile
    b_pad = _round_up(b_pad, tm)
    return tm, b_pad


def pack_params(params):
    """One-time pack + pre-cast of all weights/biases (NOT in the per-call path)."""
    w_packed = jnp.zeros((TOTAL_W_ROWS, W_COLS), jnp.float32)
    b_packed = jnp.zeros((N_LAYERS, W_COLS), jnp.float32)
    for li, (w, b) in enumerate(params):
        din, dout = LAYER_DIMS[li], LAYER_DIMS[li + 1]
        r0 = ROW_OFFSETS[li]
        w_packed = w_packed.at[r0:r0 + din, :dout].set(w)
        b_packed = b_packed.at[li, :dout].set(b.reshape(-1))
    return w_packed.astype(jnp.bfloat16), b_packed.astype(jnp.float32)


@functools.partial(jax.jit, static_argnames=("tile_m", "num_cores"))
def network_model_forward(x, w_packed, b_packed, tile_m=512, num_cores=1):
    B, D_in = x.shape
    assert D_in == LAYER_DIMS[0]

    tm, b_pad = _choose_tile(B, tile_m, num_cores)

    # Pad batch to the tile and features to 304 lanes (zeros), cast to bf16.
    x_bf16 = jnp.pad(x, ((0, b_pad - B), (0, PAD_DIMS[0] - D_in))).astype(jnp.bfloat16)

    grid = (b_pad // tm,)

    in_specs = [
        pl.BlockSpec((tm, PAD_DIMS[0]), lambda i: (i, 0)),          # x: batch-tiled
        pl.BlockSpec((TOTAL_W_ROWS, W_COLS), lambda i: (0, 0)),     # weights: grid-invariant
        pl.BlockSpec((N_LAYERS, W_COLS), lambda i: (0, 0)),         # biases: grid-invariant
    ]
    out_spec = pl.BlockSpec((tm, 128), lambda i: (i, 0))

    cost = pl.CostEstimate(
        flops=_FLOPS_PER_ROW * b_pad,
        transcendentals=0,
        bytes_accessed=(
            b_pad * PAD_DIMS[0] * 2          # x (bf16)
            + TOTAL_W_ROWS * W_COLS * 2      # packed weights (bf16)
            + N_LAYERS * W_COLS * 4          # packed biases (f32)
            + b_pad * 128 * 4                # output (f32)
        ),
    )

    out = pl.pallas_call(
        mlp_kernel,
        out_shape=jax.ShapeDtypeStruct((b_pad, 128), jnp.float32),
        grid_spec=pltpu.PrefetchScalarGridSpec(
            num_scalar_prefetch=0,
            grid=grid,
            in_specs=in_specs,
            out_specs=out_spec,
        ),
        compiler_params=pltpu.CompilerParams(
            dimension_semantics=("parallel",),
        ),
        cost_estimate=cost,
    )(x_bf16, w_packed, b_packed)

    return out[:B, :LAYER_DIMS[-1]]


# ----------------------------------------------------------------------------
# Init / reference
# ----------------------------------------------------------------------------
def init_params(key):
    """PyTorch-style init: U(-1/sqrt(fan_in), 1/sqrt(fan_in)); W stored (in, out)."""
    params = []
    for li in range(N_LAYERS):
        din, dout = LAYER_DIMS[li], LAYER_DIMS[li + 1]
        key, kw, kb = jax.random.split(key, 3)
        bound = 1.0 / jnp.sqrt(jnp.float32(din))
        w = jax.random.uniform(kw, (din, dout), jnp.float32, -bound, bound)
        b = jax.random.uniform(kb, (1, dout), jnp.float32, -bound, bound)
        params.append((w, b))
    return params


def reference_forward(x, params):
    """Pure f32 JAX reference matching the PyTorch module."""
    h = x
    for li, (w, b) in enumerate(params):
        h = h @ w + b
        if li < N_LAYERS - 1:
            h = jnp.maximum(h, 0.0)
    return h


# ----------------------------------------------------------------------------
# Self-test
# ----------------------------------------------------------------------------
if __name__ == "__main__":
    key = jax.random.PRNGKey(0)
    key, kparams = jax.random.split(key)
    params = init_params(kparams)

    # One-time pack/pre-cast of the parameters (kept out of the per-call path).
    w_packed, b_packed = pack_params(params)
    w_packed, b_packed = jax.block_until_ready((w_packed, b_packed))

    num_cores = _num_tensorcores()

    # One non-multiple-of-tile batch (exercises padding) and one that splits
    # into 2 balanced steps on 2-TC chips (exercises the megacore path).
    for B in (10, 32):
        key, kx = jax.random.split(key)
        x = jax.random.normal(kx, (B, LAYER_DIMS[0]), jnp.float32)

        out = network_model_forward(x, w_packed, b_packed, num_cores=num_cores)
        out = jax.block_until_ready(out)

        ref = reference_forward(x, params)
        assert out.shape == (B, LAYER_DIMS[-1]), out.shape
        # bf16 operands with f32 accumulation -> loosened tolerance vs f32 ref.
        assert jnp.allclose(out, ref, atol=5e-2, rtol=5e-2), (
            f"mismatch vs reference for B={B}: "
            f"max abs err {jnp.max(jnp.abs(out - ref))}"
        )

    print("KERNEL_OK")
</pallas_src>

<mosaic_0001>
module attributes {stable_mosaic.version = 11 : i64} {
  func.func @mlp_kernel(%arg0: i32, %arg1: memref<16x304xbf16, #tpu.memory_space<vmem>>, %arg2: memref<1200x256xbf16, #tpu.memory_space<vmem>>, %arg3: memref<7x256xf32, #tpu.memory_space<vmem>>, %arg4: memref<16x128xf32, #tpu.memory_space<vmem>>) attributes {dimension_semantics = [#tpu.dimension_semantics<parallel>], iteration_bounds = array<i64: 1>, scalar_prefetch = 0 : i64, scratch_operands = 0 : i64, tpu.core_type = #tpu.core_type<tc>, window_params = [{transform_indices = @transform_0, window_bounds = array<i64: 16, 304>}, {pipeline_mode = #tpu.pipeline_mode<synchronous>, transform_indices = @transform_1, window_bounds = array<i64: 1200, 256>}, {pipeline_mode = #tpu.pipeline_mode<synchronous>, transform_indices = @transform_2, window_bounds = array<i64: 7, 256>}, {transform_indices = @transform_3, window_bounds = array<i64: 16, 128>}]} {
    %c0 = arith.constant 0 : index
    %c0_0 = arith.constant 0 : index
    %0 = vector.load %arg1[%c0, %c0_0] : memref<16x304xbf16, #tpu.memory_space<vmem>>, vector<16x304xbf16>
    %c0_1 = arith.constant 0 : index
    %c0_2 = arith.constant 0 : index
    %1 = vector.load %arg2[%c0_1, %c0_2] : memref<1200x256xbf16, #tpu.memory_space<vmem>>, vector<304x256xbf16>
    %cst = arith.constant dense<0.000000e+00> : vector<16x256xf32>
    %2 = tpu.matmul %0, %1, %cst {dimension_numbers = #tpu.dot_dimension_numbers<[1], [0], [0], [1], [0, 0, 1, 1], [], []>} : vector<16x304xbf16>, vector<304x256xbf16>, vector<16x256xf32> -> vector<16x256xf32>
    %c0_3 = arith.constant 0 : index
    %c0_4 = arith.constant 0 : index
    %3 = vector.load %arg3[%c0_3, %c0_4] : memref<7x256xf32, #tpu.memory_space<vmem>>, vector<1x256xf32>
    %4 = vector.broadcast %3 : vector<1x256xf32> to vector<16x256xf32>
    %5 = arith.addf %2, %4 : vector<16x256xf32>
    %6 = arith.truncf %5 : vector<16x256xf32> to vector<16x256xbf16>
    %cst_5 = arith.constant 0.000000e+00 : bf16
    %7 = vector.broadcast %cst_5 : bf16 to vector<16x256xbf16>
    %8 = arith.maximumf %6, %7 : vector<16x256xbf16>
    %c304 = arith.constant 304 : index
    %c0_6 = arith.constant 0 : index
    %9 = vector.load %arg2[%c304, %c0_6] : memref<1200x256xbf16, #tpu.memory_space<vmem>>, vector<256x128xbf16>
    %cst_7 = arith.constant dense<0.000000e+00> : vector<16x128xf32>
    %10 = tpu.matmul %8, %9, %cst_7 {dimension_numbers = #tpu.dot_dimension_numbers<[1], [0], [0], [1], [0, 0, 1, 1], [], []>} : vector<16x256xbf16>, vector<256x128xbf16>, vector<16x128xf32> -> vector<16x128xf32>
    %c1 = arith.constant 1 : index
    %c0_8 = arith.constant 0 : index
    %11 = vector.load %arg3[%c1, %c0_8] : memref<7x256xf32, #tpu.memory_space<vmem>>, vector<1x128xf32>
    %12 = vector.broadcast %11 : vector<1x128xf32> to vector<16x128xf32>
    %13 = arith.addf %10, %12 : vector<16x128xf32>
    %14 = arith.truncf %13 : vector<16x128xf32> to vector<16x128xbf16>
    %cst_9 = arith.constant 0.000000e+00 : bf16
    %15 = vector.broadcast %cst_9 : bf16 to vector<16x128xbf16>
    %16 = arith.maximumf %14, %15 : vector<16x128xbf16>
    %c560 = arith.constant 560 : index
    %c0_10 = arith.constant 0 : index
    %17 = vector.load %arg2[%c560, %c0_10] : memref<1200x256xbf16, #tpu.memory_space<vmem>>, vector<128x128xbf16>
    %cst_11 = arith.constant dense<0.000000e+00> : vector<16x128xf32>
    %18 = tpu.matmul %16, %17, %cst_11 {dimension_numbers = #tpu.dot_dimension_numbers<[1], [0], [0], [1], [0, 0, 1, 1], [], []>} : vector<16x128xbf16>, vector<128x128xbf16>, vector<16x128xf32> -> vector<16x128xf32>
    %c2 = arith.constant 2 : index
    %c0_12 = arith.constant 0 : index
    %19 = vector.load %arg3[%c2, %c0_12] : memref<7x256xf32, #tpu.memory_space<vmem>>, vector<1x128xf32>
    %20 = vector.broadcast %19 : vector<1x128xf32> to vector<16x128xf32>
    %21 = arith.addf %18, %20 : vector<16x128xf32>
    %22 = arith.truncf %21 : vector<16x128xf32> to vector<16x128xbf16>
    %cst_13 = arith.constant 0.000000e+00 : bf16
    %23 = vector.broadcast %cst_13 : bf16 to vector<16x128xbf16>
    %24 = arith.maximumf %22, %23 : vector<16x128xbf16>
    %c688 = arith.constant 688 : index
    %c0_14 = arith.constant 0 : index
    %25 = vector.load %arg2[%c688, %c0_14] : memref<1200x256xbf16, #tpu.memory_space<vmem>>, vector<128x128xbf16>
    %cst_15 = arith.constant dense<0.000000e+00> : vector<16x128xf32>
    %26 = tpu.matmul %24, %25, %cst_15 {dimension_numbers = #tpu.dot_dimension_numbers<[1], [0], [0], [1], [0, 0, 1, 1], [], []>} : vector<16x128xbf16>, vector<128x128xbf16>, vector<16x128xf32> -> vector<16x128xf32>
    %c3 = arith.constant 3 : index
    %c0_16 = arith.constant 0 : index
    %27 = vector.load %arg3[%c3, %c0_16] : memref<7x256xf32, #tpu.memory_space<vmem>>, vector<1x128xf32>
    %28 = vector.broadcast %27 : vector<1x128xf32> to vector<16x128xf32>
    %29 = arith.addf %26, %28 : vector<16x128xf32>
    %30 = arith.truncf %29 : vector<16x128xf32> to vector<16x128xbf16>
    %cst_17 = arith.constant 0.000000e+00 : bf16
    %31 = vector.broadcast %cst_17 : bf16 to vector<16x128xbf16>
    %32 = arith.maximumf %30, %31 : vector<16x128xbf16>
    %c816 = arith.constant 816 : index
    %c0_18 = arith.constant 0 : index
    %33 = vector.load %arg2[%c816, %c0_18] : memref<1200x256xbf16, #tpu.memory_space<vmem>>, vector<128x128xbf16>
    %cst_19 = arith.constant dense<0.000000e+00> : vector<16x128xf32>
    %34 = tpu.matmul %32, %33, %cst_19 {dimension_numbers = #tpu.dot_dimension_numbers<[1], [0], [0], [1], [0, 0, 1, 1], [], []>} : vector<16x128xbf16>, vector<128x128xbf16>, vector<16x128xf32> -> vector<16x128xf32>
    %c4 = arith.constant 4 : index
    %c0_20 = arith.constant 0 : index
    %35 = vector.load %arg3[%c4, %c0_20] : memref<7x256xf32, #tpu.memory_space<vmem>>, vector<1x128xf32>
    %36 = vector.broadcast %35 : vector<1x128xf32> to vector<16x128xf32>
    %37 = arith.addf %34, %36 : vector<16x128xf32>
    %38 = arith.truncf %37 : vector<16x128xf32> to vector<16x128xbf16>
    %cst_21 = arith.constant 0.000000e+00 : bf16
    %39 = vector.broadcast %cst_21 : bf16 to vector<16x128xbf16>
    %40 = arith.maximumf %38, %39 : vector<16x128xbf16>
    %c944 = arith.constant 944 : index
    %c0_22 = arith.constant 0 : index
    %41 = vector.load %arg2[%c944, %c0_22] : memref<1200x256xbf16, #tpu.memory_space<vmem>>, vector<128x128xbf16>
    %cst_23 = arith.constant dense<0.000000e+00> : vector<16x128xf32>
    %42 = tpu.matmul %40, %41, %cst_23 {dimension_numbers = #tpu.dot_dimension_numbers<[1], [0], [0], [1], [0, 0, 1, 1], [], []>} : vector<16x128xbf16>, vector<128x128xbf16>, vector<16x128xf32> -> vector<16x128xf32>
    %c5 = arith.constant 5 : index
    %c0_24 = arith.constant 0 : index
    %43 = vector.load %arg3[%c5, %c0_24] : memref<7x256xf32, #tpu.memory_space<vmem>>, vector<1x128xf32>
    %44 = vector.broadcast %43 : vector<1x128xf32> to vector<16x128xf32>
    %45 = arith.addf %42, %44 : vector<16x128xf32>
    %46 = arith.truncf %45 : vector<16x128xf32> to vector<16x128xbf16>
    %cst_25 = arith.constant 0.000000e+00 : bf16
    %47 = vector.broadcast %cst_25 : bf16 to vector<16x128xbf16>
    %48 = arith.maximumf %46, %47 : vector<16x128xbf16>
    %c1072 = arith.constant 1072 : index
    %c0_26 = arith.constant 0 : index
    %49 = vector.load %arg2[%c1072, %c0_26] : memref<1200x256xbf16, #tpu.memory_space<vmem>>, vector<128x128xbf16>
    %cst_27 = arith.constant dense<0.000000e+00> : vector<16x128xf32>
    %50 = tpu.matmul %48, %49, %cst_27 {dimension_numbers = #tpu.dot_dimension_numbers<[1], [0], [0], [1], [0, 0, 1, 1], [], []>} : vector<16x128xbf16>, vector<128x128xbf16>, vector<16x128xf32> -> vector<16x128xf32>
    %c6 = arith.constant 6 : index
    %c0_28 = arith.constant 0 : index
    %51 = vector.load %arg3[%c6, %c0_28] : memref<7x256xf32, #tpu.memory_space<vmem>>, vector<1x128xf32>
    %52 = vector.broadcast %51 : vector<1x128xf32> to vector<16x128xf32>
    %53 = arith.addf %50, %52 : vector<16x128xf32>
    %c0_29 = arith.constant 0 : index
    %c0_30 = arith.constant 0 : index
    %54 = vector.load %arg4[%c0_29, %c0_30] : memref<16x128xf32, #tpu.memory_space<vmem>>, vector<16x128xf32>
    tpu.vector_store %arg4[%c0_29, %c0_30], %53 {strides = array<i32>} : memref<16x128xf32, #tpu.memory_space<vmem>>, vector<16x128xf32>,
    return
  }
  func.func @transform_0(%arg0: i32) -> (i32, i32) {
    %c0_i32 = arith.constant 0 : i32
    %c0_i32_0 = arith.constant 0 : i32
    return %arg0, %c0_i32 : i32, i32
  }
  func.func @transform_1(%arg0: i32) -> (i32, i32) {
    %c0_i32 = arith.constant 0 : i32
    %c0_i32_0 = arith.constant 0 : i32
    %c0_i32_1 = arith.constant 0 : i32
    return %c0_i32, %c0_i32_0 : i32, i32
  }
  func.func @transform_2(%arg0: i32) -> (i32, i32) {
    %c0_i32 = arith.constant 0 : i32
    %c0_i32_0 = arith.constant 0 : i32
    %c0_i32_1 = arith.constant 0 : i32
    return %c0_i32, %c0_i32_0 : i32, i32
  }
  func.func @transform_3(%arg0: i32) -> (i32, i32) {
    %c0_i32 = arith.constant 0 : i32
    %c0_i32_0 = arith.constant 0 : i32
    return %arg0, %c0_i32 : i32, i32
  }
}

</mosaic_0001>

<bundles_post_ra>
// kernel: network_model_forward.1
= control target key start
LH: loop header
LB: loop body
LE: loop exit
PB: predicated region body
PF: predicated region fallthrough
CT: control target
= control target key end

     0   :  { %8 = vsyncpa [#allocation3], 0  ;;  %s1494_s15 = smov [#allocation2]   ;;  %s1495_s17 = smov 128   ;;  %s1565_s0 = inlined_call_operand.vmem [shape: bf16[16,304], index: 0, kind: input, shape index: {}]   ;;  %s1566_s1 = inlined_call_operand.hbm [shape: bf16[1200,256], index: 1, kind: input, shape index: {}]   ;;  %s1567_s2 = inlined_call_operand.vmem [shape: f32[7,256], index: 2, kind: input, shape index: {}]   ;;  %s1568_s3 = inlined_call_operand.vmem [shape: f32[16,128], index: 3, kind: output, shape index: {}]  }
   0x1   :  { %s15_s14 = sshll.u32 %s1566_s1, 4  ;;  %s17_s16 = sshll.u32 %s1494_s15, 4  ;;  %s16_s14 = int_to_ptr.hbm [resolvable:$true] %s15_s14  ;;  %s18_s16 = int_to_ptr.vmem [resolvable:$true] %s17_s16 }
   0x2   :  { %s1496_s18 = smov 8  }
   0x3   :  { %23 = dma.hbm_to_vmem [thread:$0]  %s16_s14, 19200, %s18_s16, [#allocation3], %s1495_s17, %s1495_s17, %s1496_s18  }
   0x4   :  { %1492 = dma.done.wait [#allocation3], 19200  }
   0x5   :  { %1493 = vsyncadd [#allocation3], 4294948096  ;;  %v1048_v0 = vld [vmem:[#allocation2 + $0x70] sm:$0xf]  ;;  %v1386_v1 = vld [vmem:[#allocation2 + $0x74] sm:$0xf0] }
   0x6   :  { %v1112_v2 = vld [vmem:[#allocation2 + $0xf0] sm:$0xf]  ;;  %v1049_v3 = vor.u32 %v1386_v1, %v1048_v0  ;;  %v1402_v4 = vld [vmem:[#allocation2 + $0xf4] sm:$0xf0]  ;;  %v1040_v5 = vld [vmem:[#allocation2 + $0x60] sm:$0xf] }
   0x7   :  { %v1384_v6 = vld [vmem:[#allocation2 + $0x64] sm:$0xf0]  ;;  %v1113_v7 = vor.u32 %v1402_v4, %v1112_v2  ;;  %v1104_v8 = vld [vmem:[#allocation2 + $0xe0] sm:$0xf]  ;;  %v1032_v12 = vld [vmem:[#allocation2 + $0x50] sm:$0xf] }
   0x8   :  { %v1400_v9 = vld [vmem:[#allocation2 + $0xe4] sm:$0xf0]  ;;  %288 = vmatpush.bf16.msra.mxu0 %v1049_v3  ;;  %v1041_v10 = vor.u32 %v1384_v6, %v1040_v5  ;;  %v1382_v13 = vld [vmem:[#allocation2 + $0x54] sm:$0xf0]  ;;  %v1096_v14 = vld [vmem:[#allocation2 + $0xd0] sm:$0xf] }
   0x9   :  { %302 = vmatpush.bf16.msra.mxu1 %v1113_v7  ;;  %v1105_v11 = vor.u32 %v1400_v9, %v1104_v8  ;;  %v1398_v15 = vld [vmem:[#allocation2 + $0xd4] sm:$0xf0]  ;;  %v1385_v16 = vld [vmem:[#allocation2 + $0x74] sm:$0xf]  ;;  %v1050_v17 = vld [vmem:[#allocation2 + $0x78] sm:$0xf0]  ;;  %v1033_v20 = vor.u32 %v1382_v13, %v1032_v12 }
   0xa   :  { %v1053_v18 = vor.u32 %v1385_v16, %v1050_v17  ;;  %v1401_v19 = vld [vmem:[#allocation2 + $0xf4] sm:$0xf]  ;;  %v1024_v21 = vld [vmem:[#allocation2 + $0x40] sm:$0xf]  ;;  %v1380_v22 = vld [vmem:[#allocation2 + $0x44] sm:$0xf0]  ;;  %v1097_v24 = vor.u32 %v1398_v15, %v1096_v14 }
   0xb   :  { %v1114_v23 = vld [vmem:[#allocation2 + $0xf8] sm:$0xf0]  ;;  %v1088_v25 = vld [vmem:[#allocation2 + $0xc0] sm:$0xf]  ;;  %v1383_v27 = vld [vmem:[#allocation2 + $0x64] sm:$0xf]  ;;  %v1025_v35 = vor.u32 %v1380_v22, %v1024_v21 }
   0xc   :  { %289 = vmatpush.bf16.msra.mxu0 %v1041_v10  ;;  %330 = vmatpush.bf16.msra.mxu3 %v1053_v18  ;;  %v1117_v26 = vor.u32 %v1401_v19, %v1114_v23  ;;  %v1042_v28 = vld [vmem:[#allocation2 + $0x68] sm:$0xf0]  ;;  %v1396_v29 = vld [vmem:[#allocation2 + $0xc4] sm:$0xf0]  ;;  %v1399_v31 = vld [vmem:[#allocation2 + $0xe4] sm:$0xf] }
   0xd   :  { %303 = vmatpush.bf16.msra.mxu1 %v1105_v11  ;;  %v1045_v30 = vor.u32 %v1383_v27, %v1042_v28  ;;  %v1106_v32 = vld [vmem:[#allocation2 + $0xe8] sm:$0xf0]  ;;  %v1381_v34 = vld [vmem:[#allocation2 + $0x54] sm:$0xf]  ;;  %v1016_v36 = vld [vmem:[#allocation2 + $0x30] sm:$0xf]  ;;  %v1089_v39 = vor.u32 %v1396_v29, %v1088_v25 }
   0xe   :  { %344 = vmatpush.bf16.msra.mxu2 %v1117_v26  ;;  %v1109_v33 = vor.u32 %v1399_v31, %v1106_v32  ;;  %v1378_v37 = vld [vmem:[#allocation2 + $0x34] sm:$0xf0]  ;;  %v1034_v38 = vld [vmem:[#allocation2 + $0x58] sm:$0xf0]  ;;  %v1080_v40 = vld [vmem:[#allocation2 + $0xb0] sm:$0xf] }
   0xf   :  { %v1037_v41 = vor.u32 %v1381_v34, %v1034_v38  ;;  %v1397_v42 = vld [vmem:[#allocation2 + $0xd4] sm:$0xf]  ;;  %v1098_v43 = vld [vmem:[#allocation2 + $0xd8] sm:$0xf0]  ;;  %v1394_v44 = vld [vmem:[#allocation2 + $0xb4] sm:$0xf0]  ;;  %v1017_v48 = vor.u32 %v1378_v37, %v1016_v36 }
  0x10   :  { %290 = vmatpush.bf16.msra.mxu0 %v1033_v20  ;;  %331 = vmatpush.bf16.msra.mxu3 %v1045_v30  ;;  %v1379_v45 = vld [vmem:[#allocation2 + $0x44] sm:$0xf]  ;;  %v1026_v46 = vld [vmem:[#allocation2 + $0x48] sm:$0xf0]  ;;  %v1101_v47 = vor.u32 %v1397_v42, %v1098_v43  ;;  %v1081_v51 = vor.u32 %v1394_v44, %v1080_v40  ;;  %v1008_v52 = vld [vmem:[#allocation2 + $0x20] sm:$0xf] }
  0x11   :  { %304 = vmatpush.bf16.msra.mxu1 %v1097_v24  ;;  %v1395_v49 = vld [vmem:[#allocation2 + $0xc4] sm:$0xf]  ;;  %v1090_v50 = vld [vmem:[#allocation2 + $0xc8] sm:$0xf0]  ;;  %v1376_v53 = vld [vmem:[#allocation2 + $0x24] sm:$0xf0]  ;;  %v1029_v55 = vor.u32 %v1379_v45, %v1026_v46 }
  0x12   :  { %345 = vmatpush.bf16.msra.mxu2 %v1109_v33  ;;  %v1072_v54 = vld [vmem:[#allocation2 + $0xa0] sm:$0xf]  ;;  %v1392_v56 = vld [vmem:[#allocation2 + $0xa4] sm:$0xf0]  ;;  %v1377_v57 = vld [vmem:[#allocation2 + $0x34] sm:$0xf]  ;;  %v1093_v59 = vor.u32 %v1395_v49, %v1090_v50  ;;  %v1009_v60 = vor.u32 %v1376_v53, %v1008_v52 }
  0x13   :  { %v1018_v58 = vld [vmem:[#allocation2 + $0x38] sm:$0xf0]  ;;  %v1393_v61 = vld [vmem:[#allocation2 + $0xb4] sm:$0xf]  ;;  %v1073_v63 = vor.u32 %v1392_v56, %v1072_v54  ;;  %v1000_v0 = vld [vmem:[#allocation2 + $0x10] sm:$0xf] }
  0x14   :  { %291 = vmatpush.bf16.msra.mxu0 %v1025_v35  ;;  %332 = vmatpush.bf16.msra.mxu3 %v1037_v41  ;;  %v1082_v62 = vld [vmem:[#allocation2 + $0xb8] sm:$0xf0]  ;;  %v1374_v1 = vld [vmem:[#allocation2 + $0x14] sm:$0xf0]  ;;  %v1064_v2 = vld [vmem:[#allocation2 + $0x90] sm:$0xf]  ;;  %v1021_v3 = vor.u32 %v1377_v57, %v1018_v58 }
  0x15   :  { %305 = vmatpush.bf16.msra.mxu1 %v1089_v39  ;;  %v1390_v4 = vld [vmem:[#allocation2 + $0x94] sm:$0xf0]  ;;  %v1375_v5 = vld [vmem:[#allocation2 + $0x24] sm:$0xf]  ;;  %v1010_v6 = vld [vmem:[#allocation2 + $0x28] sm:$0xf0]  ;;  %v1085_v7 = vor.u32 %v1393_v61, %v1082_v62  ;;  %v1001_v8 = vor.u32 %v1374_v1, %v1000_v0 }
  0x16   :  { %346 = vmatpush.bf16.msra.mxu2 %v1101_v47  ;;  %v1391_v9 = vld [vmem:[#allocation2 + $0xa4] sm:$0xf]  ;;  %v1074_v10 = vld [vmem:[#allocation2 + $0xa8] sm:$0xf0]  ;;  %v1065_v11 = vor.u32 %v1390_v4, %v1064_v2  ;;  %v992_v12 = vld [vmem:[#allocation2] sm:$0xf]  ;;  %v1013_v15 = vor.u32 %v1375_v5, %v1010_v6 }
  0x17   :  { %v1372_v13 = vld [vmem:[#allocation2 + $0x4] sm:$0xf0]  ;;  %v1056_v14 = vld [vmem:[#allocation2 + $0x80] sm:$0xf]  ;;  %v1077_v20 = vor.u32 %v1391_v9, %v1074_v10  ;;  %v1373_v21 = vld [vmem:[#allocation2 + $0x14] sm:$0xf] }
  0x18   :  { %292 = vmatpush.bf16.msra.mxu0 %v1017_v48  ;;  %333 = vmatpush.bf16.msra.mxu3 %v1029_v55  ;;  %v1388_v16 = vld [vmem:[#allocation2 + $0x84] sm:$0xf0]  ;;  %v1136_v17 = vld [vmem:[#allocation2 + $0x120] sm:$0xf]  ;;  %v1002_v22 = vld [vmem:[#allocation2 + $0x18] sm:$0xf0]  ;;  %v993_v23 = vor.u32 %v1372_v13, %v992_v12 }
  0x19   :  { %306 = vmatpush.bf16.msra.mxu1 %v1081_v51  ;;  %v1408_v18 = vld [vmem:[#allocation2 + $0x124] sm:$0xf0]  ;;  %v980_v19 = vld [vmem:[%s1565_s0] sm:$0xf]  ;;  %v1369_v24 = vld [vmem:[%s1565_s0 + $0x8] sm:$0xf0]  ;;  %v1057_v27 = vor.u32 %v1388_v16, %v1056_v14  ;;  %v1005_v33 = vor.u32 %v1373_v21, %v1002_v22 }
  0x1a   :  { %347 = vmatpush.bf16.msra.mxu2 %v1093_v59  ;;  %v1389_v25 = vld [vmem:[#allocation2 + $0x94] sm:$0xf]  ;;  %v1066_v26 = vld [vmem:[#allocation2 + $0x98] sm:$0xf0]  ;;  %v1137_v28 = vor.u32 %v1408_v18, %v1136_v17  ;;  %v1368_v29 = vld [vmem:[%s1565_s0 + $0x4] sm:$0xf]  ;;  %v981_v34 = vor.u32 %v1369_v24, %v980_v19 }
  0x1b   :  { %v982_v30 = vld [vmem:[%s1565_s0 + $0xc] sm:$0xf0]  ;;  %v1406_v32 = vld [vmem:[#allocation2 + $0x114] sm:$0xf0]  ;;  %v1069_v35 = vor.u32 %v1389_v25, %v1066_v26  ;;  %v1371_v36 = vld [vmem:[#allocation2 + $0x4] sm:$0xf] }
  0x1c   :  { %293 = vmatpush.bf16.msra.mxu0 %v1009_v60  ;;  %334 = vmatpush.bf16.msra.mxu3 %v1021_v3  ;;  %v1128_v31 = vld [vmem:[#allocation2 + $0x110] sm:$0xf]  ;;  %v994_v37 = vld [vmem:[#allocation2 + $0x8] sm:$0xf0]  ;;  %v985_v38 = vor.u32 %v1368_v29, %v982_v30  ;;  %v1387_v39 = vld [vmem:[#allocation2 + $0x84] sm:$0xf] }
  0x1d   :  { %307 = vmatpush.bf16.msra.mxu1 %v1073_v63  ;;  %v1058_v40 = vld [vmem:[#allocation2 + $0x88] sm:$0xf0]  ;;  %v1129_v41 = vor.u32 %v1406_v32, %v1128_v31  ;;  %v1120_v42 = vld [vmem:[#allocation2 + $0x100] sm:$0xf]  ;;  %v1404_v43 = vld [vmem:[#allocation2 + $0x104] sm:$0xf0]  ;;  %v997_v44 = vor.u32 %v1371_v36, %v994_v37 }
  0x1e   :  { %348 = vmatpush.bf16.msra.mxu2 %v1085_v7  ;;  %v1061_v45 = vor.u32 %v1387_v39, %v1058_v40  ;;  %v1407_v46 = vld [vmem:[#allocation2 + $0x124] sm:$0xf]  ;;  %v1138_v47 = vld [vmem:[#allocation2 + $0x128] sm:$0xf0]  ;;  %v1121_v48 = vor.u32 %v1404_v43, %v1120_v42  ;;  %v1405_v50 = vld [vmem:[#allocation2 + $0x114] sm:$0xf] }
  0x1f   :  { %v1141_v49 = vor.u32 %v1407_v46, %v1138_v47  ;;  %v1130_v51 = vld [vmem:[#allocation2 + $0x118] sm:$0xf0]  ;;  %v1403_v53 = vld [vmem:[#allocation2 + $0x104] sm:$0xf]  ;;  %v1122_v54 = vld [vmem:[#allocation2 + $0x108] sm:$0xf0] }
  0x20   :  { %294 = vmatpush.bf16.msra.mxu0 %v1001_v8  ;;  %335 = vmatpush.bf16.msra.mxu3 %v1013_v15  ;;  %v1133_v52 = vor.u32 %v1405_v50, %v1130_v51  ;;  %v988_v55 = vld [vmem:[%s1565_s0 + $0x8] sm:$0xf]  ;;  %v1370_v56 = vld [vmem:[%s1565_s0 + $0x10] sm:$0xf0]  ;;  %v1125_v57 = vor.u32 %v1403_v53, %v1122_v54  ;;  %vm284_vm0 = vcmask 392192  }
  0x21   :  { %308 = vmatpush.bf16.msra.mxu1 %v1065_v11  ;;  %v989_v58 = vor.u32 %v1370_v56, %v988_v55  ;;  %v1174_v59 = vld [vmem:[#allocation2 + $0x1a0] sm:$0xf]  ;;  %v1416_v60 = vld [vmem:[#allocation2 + $0x1a4] sm:$0xf0]  ;;  %v1170_v62 = vld [vmem:[#allocation2 + $0x190] sm:$0xf] }
  0x22   :  { %349 = vmatpush.bf16.msra.mxu2 %v1077_v20  ;;  %v1175_v61 = vor.u32 %v1416_v60, %v1174_v59  ;;  %v1415_v63 = vld [vmem:[#allocation2 + $0x194] sm:$0xf0]  ;;  %v1166_v1 = vld [vmem:[#allocation2 + $0x180] sm:$0xf]  ;;  %v1414_v2 = vld [vmem:[#allocation2 + $0x184] sm:$0xf0] }
  0x23   :  { %v1171_v0 = vor.u32 %v1415_v63, %v1170_v62  ;;  %v1167_v3 = vor.u32 %v1414_v2, %v1166_v1  ;;  %v1162_v4 = vld [vmem:[#allocation2 + $0x170] sm:$0xf]  ;;  %v1413_v5 = vld [vmem:[#allocation2 + $0x174] sm:$0xf0]  ;;  %v1158_v7 = vld [vmem:[#allocation2 + $0x160] sm:$0xf] }
  0x24   :  { %295 = vmatpush.bf16.msra.mxu0 %v993_v23  ;;  %336 = vmatpush.bf16.msra.mxu3 %v1005_v33  ;;  %v1163_v6 = vor.u32 %v1413_v5, %v1162_v4  ;;  %v1412_v8 = vld [vmem:[#allocation2 + $0x164] sm:$0xf0]  ;;  %v1206_v9 = vld [vmem:[#allocation2 + $0x220] sm:$0xf]  ;;  %v1154_v13 = vld [vmem:[#allocation2 + $0x150] sm:$0xf] }
  0x25   :  { %309 = vmatpush.bf16.msra.mxu1 %v1057_v27  ;;  %v1159_v10 = vor.u32 %v1412_v8, %v1158_v7  ;;  %v1424_v11 = vld [vmem:[#allocation2 + $0x224] sm:$0xf0]  ;;  %v1411_v14 = vld [vmem:[#allocation2 + $0x154] sm:$0xf0]  ;;  %v1202_v15 = vld [vmem:[#allocation2 + $0x210] sm:$0xf] }
  0x26   :  { %350 = vmatpush.bf16.msra.mxu2 %v1069_v35  ;;  %v1207_v12 = vor.u32 %v1424_v11, %v1206_v9  ;;  %v1155_v16 = vor.u32 %v1411_v14, %v1154_v13  ;;  %v1423_v17 = vld [vmem:[#allocation2 + $0x214] sm:$0xf0]  ;;  %v1150_v19 = vld [vmem:[#allocation2 + $0x140] sm:$0xf]  ;;  %v1410_v20 = vld [vmem:[#allocation2 + $0x144] sm:$0xf0] }
  0x27   :  { %296 = vmatmul.bf16.vlgmr.msra.gmra.mxu0 %v981_v34  ;;  %v1203_v18 = vor.u32 %v1423_v17, %v1202_v15  ;;  %v1198_v21 = vld [vmem:[#allocation2 + $0x200] sm:$0xf]  ;;  %v1151_v22 = vor.u32 %v1410_v20, %v1150_v19  ;;  %v1422_v23 = vld [vmem:[#allocation2 + $0x204] sm:$0xf0]  ;;  %v1146_v25 = vld [vmem:[#allocation2 + $0x130] sm:$0xf] }
  0x28   :  { %321 = vmatpush.bf16.msrb.mxu0 %v1137_v28  ;;  %310 = vmatmul.bf16.vlgmr.msra.gmra.mxu1 %v985_v38  ;;  %v1199_v24 = vor.u32 %v1422_v23, %v1198_v21  ;;  %v1409_v26 = vld [vmem:[#allocation2 + $0x134] sm:$0xf0]  ;;  %v1194_v27 = vld [vmem:[#allocation2 + $0x1f0] sm:$0xf]  ;;  %v1190_v31 = vld [vmem:[#allocation2 + $0x1e0] sm:$0xf] }
  0x29   :  { %337 = vmatpush.bf16.msra.mxu3 %v997_v44  ;;  %513 = vmatpush.bf16.msrb.mxu1 %v1175_v61  ;;  %v1147_v28 = vor.u32 %v1409_v26, %v1146_v25  ;;  %v1421_v29 = vld [vmem:[#allocation2 + $0x1f4] sm:$0xf0]  ;;  %v1420_v32 = vld [vmem:[#allocation2 + $0x1e4] sm:$0xf0]  ;;  %v1186_v35 = vld [vmem:[#allocation2 + $0x1d0] sm:$0xf] }
  0x2a   :  { %351 = vmatpush.bf16.msra.mxu2 %v1061_v45  ;;  %v1195_v30 = vor.u32 %v1421_v29, %v1194_v27  ;;  %v1191_v33 = vor.u32 %v1420_v32, %v1190_v31  ;;  %v1419_v36 = vld [vmem:[#allocation2 + $0x1d4] sm:$0xf0]  ;;  %v1418_v39 = vld [vmem:[#allocation2 + $0x1c4] sm:$0xf0]  ;;  %v1178_v42 = vld [vmem:[#allocation2 + $0x1b0] sm:$0xf] }
  0x2b   :  { %v1187_v37 = vor.u32 %v1419_v36, %v1186_v35  ;;  %v1417_v43 = vld [vmem:[#allocation2 + $0x1b4] sm:$0xf0]  ;;  %v73_v44 = vld [vmem:[%s1567_s2] ss:$8 sm:$0x3] }
  0x2c   :  { %322 = vmatpush.bf16.msrb.mxu0 %v1129_v41  ;;  %338 = vmatmul.bf16.vlgmr.msra.gmra.mxu3 %v981_v34  ;;  %v1179_v46 = vor.u32 %v1417_v43, %v1178_v42  ;;  %v75_v47 = vperm.slane %v73_v44, 0  ;;  %v76_v60 = vperm.slane %v73_v44, 1  ;;  %v1432_v13 = vld [vmem:[#allocation2 + $0x2a4] sm:$0xf0]  ;;  %v1234_v15 = vld [vmem:[#allocation2 + $0x290] sm:$0xf] }
  0x2d   :  { %352 = vmatmul.bf16.vlgmr.msra.gmra.mxu2 %v985_v38  ;;  %514 = vmatpush.bf16.msrb.mxu1 %v1171_v0  ;;  %v1182_v38 = vld [vmem:[#allocation2 + $0x1c0] sm:$0xf]  ;;  %v1430_v19 = vld [vmem:[#allocation2 + $0x284] sm:$0xf0]  ;;  %v1226_v21 = vld [vmem:[#allocation2 + $0x270] sm:$0xf] }
  0x2e   :  { %527 = vmatpush.bf16.msrb.mxu3 %v1207_v12  ;;  %v1183_v40 = vor.u32 %v1418_v39, %v1182_v38  ;;  %v1238_v12 = vld [vmem:[#allocation2 + $0x2a0] sm:$0xf]  ;;  %v1428_v25 = vld [vmem:[#allocation2 + $0x264] sm:$0xf0]  ;;  %v1218_v27 = vld [vmem:[#allocation2 + $0x250] sm:$0xf] }
  0x2f   :  { %v1239_v14 = vor.u32 %v1432_v13, %v1238_v12  ;;  %v1426_v31 = vld [vmem:[#allocation2 + $0x244] sm:$0xf0]  ;;  %v1270_v36 = vld [vmem:[#allocation2 + $0x320] sm:$0xf]  ;;  %v1266_v38 = vld [vmem:[#allocation2 + $0x310] sm:$0xf] }
  0x30   :  { %323 = vmatpush.bf16.msrb.mxu0 %v1121_v48  ;;  %v1262_v42 = vld [vmem:[#allocation2 + $0x300] sm:$0xf]  ;;  %v1438_v43 = vld [vmem:[#allocation2 + $0x304] sm:$0xf0]  ;;  %v1447_v12 = vld [vmem:[#allocation2 + $0x394] sm:$0xf0] }
  0x31   :  { %515 = vmatpush.bf16.msrb.mxu1 %v1167_v3  ;;  %613 = vmatpush.bf16.msrb.mxu2 %v1239_v14  ;;  %v1263_v44 = vor.u32 %v1438_v43, %v1262_v42  ;;  %v1294_v14 = vld [vmem:[#allocation2 + $0x380] sm:$0xf]  ;;  %v1330_v42 = vld [vmem:[#allocation2 + $0x410] sm:$0xf] }
  0x32   :  { %528 = vmatpush.bf16.msrb.mxu3 %v1203_v18  ;;  %v1230_v18 = vld [vmem:[#allocation2 + $0x280] sm:$0xf] }
  0x33   :  { %v1231_v20 = vor.u32 %v1430_v19, %v1230_v18  ;;  %v1445_v18 = vld [vmem:[#allocation2 + $0x374] sm:$0xf0] }
  0x34   :  { %363 = vmatpush.bf16.msra.mxu0 %v1141_v49 }
  0x35   :  { %516 = vmatpush.bf16.msrb.mxu1 %v1163_v6 }
  0x36   :  { %529 = vmatpush.bf16.msrb.mxu3 %v1199_v24  ;;  %v1222_v24 = vld [vmem:[#allocation2 + $0x260] sm:$0xf] }
  0x37   :  { %1142 = vmatmul.msk.bf16.vlgmr.msrb.gmra.mxu0 %vm284_vm0, %v989_v58  ;;  %v1223_v26 = vor.u32 %v1428_v25, %v1222_v24 }
  0x38   :  { %364 = vmatpush.bf16.msra.mxu0 %v1133_v52 }
  0x39   :  { %517 = vmatpush.bf16.msrb.mxu1 %v1159_v10 }
  0x3a   :  { %530 = vmatpush.bf16.msrb.mxu3 %v1195_v30  ;;  %v1214_v30 = vld [vmem:[#allocation2 + $0x240] sm:$0xf] }
  0x3b   :  { %v1215_v32 = vor.u32 %v1426_v31, %v1214_v30  ;;  %v1282_v31 = vld [vmem:[#allocation2 + $0x350] sm:$0xf] }
  0x3c   :  { %365 = vmatpush.bf16.msra.mxu0 %v1125_v57 }
  0x3d   :  { %518 = vmatpush.bf16.msrb.mxu1 %v1155_v16  ;;  %v1431_v16 = vld [vmem:[#allocation2 + $0x294] sm:$0xf0] }
  0x3e   :  { %531 = vmatpush.bf16.msrb.mxu3 %v1191_v33  ;;  %v1235_v17 = vor.u32 %v1431_v16, %v1234_v15  ;;  %v1210_v33 = vld [vmem:[#allocation2 + $0x230] sm:$0xf]  ;;  %v1446_v15 = vld [vmem:[#allocation2 + $0x384] sm:$0xf0] }
  0x3f   :  { %v1295_v16 = vor.u32 %v1446_v15, %v1294_v14  ;;  %v1358_v14 = vld [vmem:[#allocation2 + $0x480] sm:$0xf]  ;;  %v1462_v15 = vld [vmem:[#allocation2 + $0x484] sm:$0xf0] }
  0x40   :  { %614 = vmatpush.bf16.msrb.mxu2 %v1235_v17  ;;  %v1290_v17 = vld [vmem:[#allocation2 + $0x370] sm:$0xf] }
  0x41   :  { %519 = vmatpush.bf16.msrb.mxu1 %v1151_v22  ;;  %v1429_v22 = vld [vmem:[#allocation2 + $0x274] sm:$0xf0]  ;;  %v1291_v19 = vor.u32 %v1445_v18, %v1290_v17  ;;  %v1354_v17 = vld [vmem:[#allocation2 + $0x470] sm:$0xf] }
  0x42   :  { %532 = vmatpush.bf16.msrb.mxu3 %v1187_v37  ;;  %v1227_v23 = vor.u32 %v1429_v22, %v1226_v21  ;;  %v1440_v37 = vld [vmem:[#allocation2 + $0x324] sm:$0xf0]  ;;  %v564_v21 = vld [vmem:[%s1567_s2 + $0x2] ss:$0 sm:$0xff]  ;;  %v1461_v18 = vld [vmem:[#allocation2 + $0x474] sm:$0xf0] }
  0x43   :  { %v1271_v39 = vor.u32 %v1440_v37, %v1270_v36  ;;  %v1274_v37 = vld [vmem:[#allocation2 + $0x330] sm:$0xf] }
  0x44   :  { %615 = vmatpush.bf16.msrb.mxu2 %v1231_v20 }
  0x45   :  { %520 = vmatpush.bf16.msrb.mxu1 %v1147_v28  ;;  %v1427_v28 = vld [vmem:[#allocation2 + $0x254] sm:$0xf0]  ;;  %699 = vmatpush.bf16.msrb.mxu0 %v1271_v39 }
  0x46   :  { %533 = vmatpush.bf16.msrb.mxu3 %v1183_v40  ;;  %v1219_v29 = vor.u32 %v1427_v28, %v1218_v27  ;;  %v1439_v40 = vld [vmem:[#allocation2 + $0x314] sm:$0xf0]  ;;  %v1286_v28 = vld [vmem:[#allocation2 + $0x360] sm:$0xf] }
  0x47   :  { %1143 = vmatmul.msk.bf16.vlgmr.msra.gmra.mxu0 %vm284_vm0, %v989_v58 }
  0x48   :  { %616 = vmatpush.bf16.msrb.mxu2 %v1227_v23 }
  0x4a   :  { %534 = vmatpush.bf16.msrb.mxu3 %v1179_v46  ;;  %v1437_v46 = vld [vmem:[#allocation2 + $0x2f4] sm:$0xf0] }
  0x4c   :  { %617 = vmatpush.bf16.msrb.mxu2 %v1223_v26 }
  0x50   :  { %618 = vmatpush.bf16.msrb.mxu2 %v1219_v29  ;;  %v1444_v29 = vld [vmem:[#allocation2 + $0x364] sm:$0xf0] }
  0x51   :  { %v1287_v30 = vor.u32 %v1444_v29, %v1286_v28  ;;  %v1350_v28 = vld [vmem:[#allocation2 + $0x460] sm:$0xf]  ;;  %v1460_v29 = vld [vmem:[#allocation2 + $0x464] sm:$0xf0] }
  0x54   :  { %619 = vmatpush.bf16.msrb.mxu2 %v1215_v32  ;;  %v1443_v32 = vld [vmem:[#allocation2 + $0x354] sm:$0xf0] }
  0xa4   :  { %v297_v34 = vpop.f32.mrf.mxu0 }
  0xa5   :  { %v311_v45 = vpop.f32.mrf.mxu1  ;;  %v298_v49 = vadd.f32 %v297_v34, %v75_v47  ;;  %v1425_v34 = vld [vmem:[#allocation2 + $0x234] sm:$0xf0] }
  0xa6   :  { %v1211_v35 = vor.u32 %v1425_v34, %v1210_v33  ;;  %v1283_v33 = vor.u32 %v1443_v32, %v1282_v31  ;;  %v1278_v34 = vld [vmem:[#allocation2 + $0x340] sm:$0xf]  ;;  %v1346_v31 = vld [vmem:[#allocation2 + $0x450] sm:$0xf]  ;;  %v1459_v32 = vld [vmem:[#allocation2 + $0x454] sm:$0xf0] }
  0xa7   :  { %v312_v52 = vadd.f32 %v311_v45, %v298_v49  ;;  %v1258_v45 = vld [vmem:[#allocation2 + $0x2f0] sm:$0xf] }
  0xa8   :  { %620 = vmatpush.bf16.msrb.mxu2 %v1211_v35  ;;  %v1442_v35 = vld [vmem:[#allocation2 + $0x344] sm:$0xf0] }
  0xa9   :  { %v1279_v36 = vor.u32 %v1442_v35, %v1278_v34  ;;  %v1342_v34 = vld [vmem:[#allocation2 + $0x440] sm:$0xf]  ;;  %v1458_v35 = vld [vmem:[#allocation2 + $0x444] sm:$0xf0] }
  0xac   :  { %v299_v41 = vpop.f32.mrf.mxu0 }
  0xad   :  { %v300_v50 = vadd.f32 %v299_v41, %v75_v47  ;;  %v313_v51 = vpop.f32.mrf.mxu1  ;;  %v1267_v41 = vor.u32 %v1439_v40, %v1266_v38  ;;  %v1441_v38 = vld [vmem:[#allocation2 + $0x334] sm:$0xf0]  ;;  %v1334_v40 = vld [vmem:[#allocation2 + $0x420] sm:$0xf] }
  0xae   :  { %v1275_v39 = vor.u32 %v1441_v38, %v1274_v37  ;;  %v1338_v37 = vld [vmem:[#allocation2 + $0x430] sm:$0xf]  ;;  %v1457_v38 = vld [vmem:[#allocation2 + $0x434] sm:$0xf0] }
  0xaf   :  { %v339_v53 = vpop.f32.mrf.mxu3  ;;  %v314_v54 = vadd.f32 %v313_v51, %v300_v50  ;;  %700 = vmatpush.bf16.msrb.mxu0 %v1267_v41  ;;  %v416_v50 = vld [vmem:[%s1567_s2 + $0x1] ss:$0 sm:$0xff]  ;;  %v1456_v41 = vld [vmem:[#allocation2 + $0x424] sm:$0xf0] }
  0xb0   :  { %v353_v58 = vpop.f32.mrf.mxu2  ;;  %v340_v63 = vadd.f32 %v339_v53, %v76_v60  ;;  %v1335_v43 = vor.u32 %v1456_v41, %v1334_v40  ;;  %v822_v41 = vld [vmem:[%s1567_s2 + $0x5] ss:$0 sm:$0xff] }
  0xb2   :  { %v354_v2 = vadd.f32 %v353_v58, %v340_v63  ;;  %v1250_v63 = vld [vmem:[#allocation2 + $0x2d0] sm:$0xf]  ;;  %871 = vmatpush.bf16.msra.mxu3 %v1335_v43 }
  0xb3   :  { %701 = vmatpush.bf16.msrb.mxu0 %v1263_v44  ;;  %v1455_v44 = vld [vmem:[#allocation2 + $0x414] sm:$0xf0] }
  0xb4   :  { %v325_v48 = vpop.f32.mrf.mxu0 }
  0xb5   :  { %v326_v55 = vadd.f32 %v325_v48, %v312_v52  ;;  %v1259_v48 = vor.u32 %v1437_v46, %v1258_v45  ;;  %v1331_v45 = vor.u32 %v1455_v44, %v1330_v42  ;;  %v1326_v46 = vld [vmem:[#allocation2 + $0x400] sm:$0xf] }
  0xb7   :  { %v378_v59 = vmax.f32 %v326_v55, 0.0  ;;  %v341_v0 = vpop.f32.mrf.mxu3  ;;  %702 = vmatpush.bf16.msrb.mxu0 %v1259_v48  ;;  %872 = vmatpush.bf16.msra.mxu3 %v1331_v45 }
  0xb8   :  { %v342_v3 = vadd.f32 %v341_v0, %v76_v60  ;;  %v355_v4 = vpop.f32.mrf.mxu2  ;;  %v1254_v60 = vld [vmem:[#allocation2 + $0x2e0] sm:$0xf]  ;;  %v1435_v0 = vld [vmem:[#allocation2 + $0x2d4] sm:$0xf0] }
  0xba   :  { %v356_v5 = vadd.f32 %v355_v4, %v342_v3  ;;  %v1434_v3 = vld [vmem:[#allocation2 + $0x2c4] sm:$0xf0] }
  0xbc   :  { %v327_v56 = vpop.f32.mrf.mxu0 }
  0xbd   :  { %v328_v57 = vadd.f32 %v327_v56, %v314_v54 }
  0xbf   :  { %v380_v61 = vmax.f32 %v328_v57, 0.0 }
  0xc1   :  { %v382_v62 = vpack.c.bf16 %v380_v61, %v378_v59  ;;  %v1436_v61 = vld [vmem:[#allocation2 + $0x2e4] sm:$0xf0] }
  0xc3   :  { %521 = vmatmul.bf16.vlgmr.msrb.gmra.mxu1 %v382_v62  ;;  %v1255_v62 = vor.u32 %v1436_v61, %v1254_v60  ;;  %v1318_v60 = vld [vmem:[#allocation2 + $0x3e0] sm:$0xf]  ;;  %v1452_v61 = vld [vmem:[#allocation2 + $0x3e4] sm:$0xf0] }
  0xc4   :  { %v367_v1 = vpop.f32.mrf.mxu0 }
  0xc5   :  { %v368_v6 = vadd.f32 %v367_v1, %v354_v2  ;;  %703 = vmatpush.bf16.msrb.mxu0 %v1255_v62  ;;  %v1251_v1 = vor.u32 %v1435_v0, %v1250_v63  ;;  %v1246_v2 = vld [vmem:[#allocation2 + $0x2c0] sm:$0xf]  ;;  %v1319_v62 = vor.u32 %v1452_v61, %v1318_v60  ;;  %v1314_v63 = vld [vmem:[#allocation2 + $0x3d0] sm:$0xf]  ;;  %v1451_v0 = vld [vmem:[#allocation2 + $0x3d4] sm:$0xf0] }
  0xc6   :  { %v1247_v4 = vor.u32 %v1434_v3, %v1246_v2  ;;  %v1310_v2 = vld [vmem:[#allocation2 + $0x3c0] sm:$0xf]  ;;  %v1450_v3 = vld [vmem:[#allocation2 + $0x3c4] sm:$0xf0] }
  0xc7   :  { %v379_v9 = vmax.f32 %v368_v6, 0.0  ;;  %v1433_v6 = vld [vmem:[#allocation2 + $0x2b4] sm:$0xf0] }
  0xc9   :  { %704 = vmatpush.bf16.msrb.mxu0 %v1251_v1  ;;  %v1315_v1 = vor.u32 %v1451_v0, %v1314_v63 }
  0xcc   :  { %v369_v7 = vpop.f32.mrf.mxu0 }
  0xcd   :  { %v370_v8 = vadd.f32 %v369_v7, %v356_v5  ;;  %705 = vmatpush.bf16.msrb.mxu0 %v1247_v4  ;;  %v1242_v5 = vld [vmem:[#allocation2 + $0x2b0] sm:$0xf]  ;;  %v1311_v4 = vor.u32 %v1450_v3, %v1310_v2 }
  0xce   :  { %v1243_v7 = vor.u32 %v1433_v6, %v1242_v5  ;;  %v1306_v5 = vld [vmem:[#allocation2 + $0x3b0] sm:$0xf]  ;;  %v1449_v6 = vld [vmem:[#allocation2 + $0x3b4] sm:$0xf0] }
  0xcf   :  { %v381_v10 = vmax.f32 %v370_v8, 0.0  ;;  %v1302_v8 = vld [vmem:[#allocation2 + $0x3a0] sm:$0xf] }
  0xd1   :  { %v383_v11 = vpack.c.bf16 %v381_v10, %v379_v9  ;;  %706 = vmatpush.bf16.msrb.mxu0 %v1243_v7  ;;  %v1448_v9 = vld [vmem:[#allocation2 + $0x3a4] sm:$0xf0]  ;;  %v1298_v10 = vld [vmem:[#allocation2 + $0x390] sm:$0xf]  ;;  %v1307_v7 = vor.u32 %v1449_v6, %v1306_v5 }
  0xd2   :  { %v1299_v13 = vor.u32 %v1447_v12, %v1298_v10  ;;  %v1362_v10 = vld [vmem:[#allocation2 + $0x490] sm:$0xf]  ;;  %v1463_v12 = vld [vmem:[#allocation2 + $0x494] sm:$0xf0] }
  0xd3   :  { %535 = vmatmul.bf16.vlgmr.msrb.gmra.mxu3 %v383_v11  ;;  %v1303_v11 = vor.u32 %v1448_v9, %v1302_v8  ;;  %v1366_v8 = vld [vmem:[#allocation2 + $0x4a0] sm:$0xf]  ;;  %v1464_v9 = vld [vmem:[#allocation2 + $0x4a4] sm:$0xf0] }
  0xd5   :  { %785 = vmatpush.bf16.msra.mxu1 %v1303_v11  ;;  %v1367_v11 = vor.u32 %v1464_v9, %v1366_v8 }
  0xd7   :  { %957 = vmatpush.bf16.msra.mxu2 %v1367_v11 }
  0xd9   :  { %786 = vmatpush.bf16.msra.mxu1 %v1299_v13  ;;  %v1363_v13 = vor.u32 %v1463_v12, %v1362_v10 }
  0xdb   :  { %958 = vmatpush.bf16.msra.mxu2 %v1363_v13 }
  0xdd   :  { %787 = vmatpush.bf16.msra.mxu1 %v1295_v16  ;;  %v1359_v16 = vor.u32 %v1462_v15, %v1358_v14 }
  0xdf   :  { %959 = vmatpush.bf16.msra.mxu2 %v1359_v16 }
  0xe1   :  { %788 = vmatpush.bf16.msra.mxu1 %v1291_v19  ;;  %v1355_v19 = vor.u32 %v1461_v18, %v1354_v17 }
  0xe3   :  { %960 = vmatpush.bf16.msra.mxu2 %v1355_v19 }
  0xe5   :  { %789 = vmatpush.bf16.msra.mxu1 %v1287_v30  ;;  %v1351_v30 = vor.u32 %v1460_v29, %v1350_v28 }
  0xe7   :  { %961 = vmatpush.bf16.msra.mxu2 %v1351_v30 }
  0xe9   :  { %790 = vmatpush.bf16.msra.mxu1 %v1283_v33  ;;  %v1347_v33 = vor.u32 %v1459_v32, %v1346_v31 }
  0xeb   :  { %962 = vmatpush.bf16.msra.mxu2 %v1347_v33 }
  0xed   :  { %791 = vmatpush.bf16.msra.mxu1 %v1279_v36  ;;  %v1343_v36 = vor.u32 %v1458_v35, %v1342_v34 }
  0xef   :  { %963 = vmatpush.bf16.msra.mxu2 %v1343_v36 }
  0xf1   :  { %792 = vmatpush.bf16.msra.mxu1 %v1275_v39  ;;  %v1339_v39 = vor.u32 %v1457_v38, %v1338_v37 }
  0xf3   :  { %964 = vmatpush.bf16.msra.mxu2 %v1339_v39 }
 0x140   :  { %v522_v47 = vpop.f32.mrf.mxu1 }
 0x141   :  { %v523_v52 = vadd.f32 %v522_v47, %v416_v50  ;;  %v1454_v47 = vld [vmem:[#allocation2 + $0x404] sm:$0xf0] }
 0x142   :  { %v1327_v48 = vor.u32 %v1454_v47, %v1326_v46 }
 0x144   :  { %873 = vmatpush.bf16.msra.mxu3 %v1327_v48  ;;  %v908_v48 = vld [vmem:[%s1567_s2 + $0x6] ss:$0 sm:$0xff] }
 0x148   :  { %v524_v51 = vpop.f32.mrf.mxu1 }
 0x149   :  { %v525_v53 = vadd.f32 %v524_v51, %v416_v50  ;;  %v1453_v50 = vld [vmem:[#allocation2 + $0x3f4] sm:$0xf0] }
 0x156   :  { %v536_v49 = vpop.f32.mrf.mxu3 }
 0x157   :  { %v537_v54 = vadd.f32 %v536_v49, %v523_v52  ;;  %v1322_v49 = vld [vmem:[#allocation2 + $0x3f0] sm:$0xf] }
 0x158   :  { %v1323_v51 = vor.u32 %v1453_v50, %v1322_v49 }
 0x159   :  { %v545_v57 = vmax.f32 %v537_v54, 0.0 }
 0x15a   :  { %874 = vmatpush.bf16.msra.mxu3 %v1323_v51 }
 0x15e   :  { %v538_v55 = vpop.f32.mrf.mxu3  ;;  %875 = vmatpush.bf16.msra.mxu3 %v1319_v62 }
 0x15f   :  { %v539_v56 = vadd.f32 %v538_v55, %v525_v53  ;;  %v650_v53 = vld [vmem:[%s1567_s2 + $0x3] ss:$0 sm:$0xff] }
 0x161   :  { %v546_v58 = vmax.f32 %v539_v56, 0.0 }
 0x162   :  { %876 = vmatpush.bf16.msra.mxu3 %v1315_v1 }
 0x163   :  { %v547_v59 = vpack.c.bf16 %v546_v58, %v545_v57 }
 0x165   :  { %621 = vmatmul.bf16.vlgmr.msrb.gmra.mxu2 %v547_v59 }
 0x166   :  { %877 = vmatpush.bf16.msra.mxu3 %v1311_v4 }
 0x16a   :  { %878 = vmatpush.bf16.msra.mxu3 %v1307_v7 }
 0x1e8   :  { %v622_v20 = vpop.f32.mrf.mxu2 }
 0x1e9   :  { %v623_v22 = vadd.f32 %v622_v20, %v564_v21 }
 0x1eb   :  { %v631_v25 = vmax.f32 %v623_v22, 0.0 }
 0x1f0   :  { %v624_v23 = vpop.f32.mrf.mxu2 }
 0x1f1   :  { %v625_v24 = vadd.f32 %v624_v23, %v564_v21  ;;  %v736_v21 = vld [vmem:[%s1567_s2 + $0x4] ss:$0 sm:$0xff] }
 0x1f3   :  { %v632_v26 = vmax.f32 %v625_v24, 0.0 }
 0x1f5   :  { %v633_v27 = vpack.c.bf16 %v632_v26, %v631_v25 }
 0x1f7   :  { %707 = vmatmul.bf16.vlgmr.msrb.gmra.mxu0 %v633_v27 }
 0x274   :  { %v708_v52 = vpop.f32.mrf.mxu0 }
 0x275   :  { %v709_v54 = vadd.f32 %v708_v52, %v650_v53 }
 0x277   :  { %v717_v57 = vmax.f32 %v709_v54, 0.0 }
 0x27c   :  { %v710_v55 = vpop.f32.mrf.mxu0 }
 0x27d   :  { %v711_v56 = vadd.f32 %v710_v55, %v650_v53 }
 0x27f   :  { %v718_v58 = vmax.f32 %v711_v56, 0.0 }
 0x281   :  { %v719_v59 = vpack.c.bf16 %v718_v58, %v717_v57 }
 0x283   :  { %793 = vmatmul.bf16.vlgmr.msra.gmra.mxu1 %v719_v59 }
 0x300   :  { %v794_v20 = vpop.f32.mrf.mxu1 }
 0x301   :  { %v795_v22 = vadd.f32 %v794_v20, %v736_v21 }
 0x303   :  { %v803_v25 = vmax.f32 %v795_v22, 0.0 }
 0x308   :  { %v796_v23 = vpop.f32.mrf.mxu1 }
 0x309   :  { %v797_v24 = vadd.f32 %v796_v23, %v736_v21 }
 0x30b   :  { %v804_v26 = vmax.f32 %v797_v24, 0.0 }
 0x30d   :  { %v805_v27 = vpack.c.bf16 %v804_v26, %v803_v25 }
 0x30f   :  { %879 = vmatmul.bf16.vlgmr.msra.gmra.mxu3 %v805_v27 }
 0x392   :  { %v880_v40 = vpop.f32.mrf.mxu3 }
 0x393   :  { %v881_v42 = vadd.f32 %v880_v40, %v822_v41 }
 0x395   :  { %v889_v45 = vmax.f32 %v881_v42, 0.0 }
 0x39a   :  { %v882_v43 = vpop.f32.mrf.mxu3 }
 0x39b   :  { %v883_v44 = vadd.f32 %v882_v43, %v822_v41 }
 0x39d   :  { %v890_v46 = vmax.f32 %v883_v44, 0.0 }
 0x39f   :  { %v891_v47 = vpack.c.bf16 %v890_v46, %v889_v45 }
 0x3a1   :  { %965 = vmatmul.bf16.vlgmr.msra.gmra.mxu2 %v891_v47 }
 0x424   :  { %v966_v49 = vpop.f32.mrf.mxu2 }
 0x425   :  { %v967_v50 = vadd.f32 %v966_v49, %v908_v48 }
 0x427   :  { %971 = vst [vmem:[%s1568_s3] sm:$0xff] %v967_v50 }
 0x42c   :  { %v968_v51 = vpop.f32.mrf.mxu2 }
 0x42d   :  { %v969_v52 = vadd.f32 %v968_v51, %v908_v48 }
 0x42f   :  { %972 = vst [vmem:[%s1568_s3 + $0x8] sm:$0xff] %v969_v52 }
 0x430   :  { %977 = vsyncpa [#allocation3], 1 }

</bundles_post_ra>
